<compile_context>
chip_gen: v5e
topology: v5e:2x2
jax: 0.10.0
libtpu: 0.0.40
codegen_flags: <defaults>
</compile_context>

<pallas_src>
import functools
import math

import jax
import jax.numpy as jnp
import numpy as np
from jax import lax
from jax.experimental import pallas as pl
from jax.experimental.pallas import tpu as pltpu

_BN_EPS = 1e-5


# ----------------------------------------------------------------------------
# Pallas kernel: whole Block forward in one program (demo shapes fit VMEM)
# ----------------------------------------------------------------------------
def _block_kernel(x_ref, lapT_ref,
                  w1_ref, g1_ref, be1_ref,
                  w2_ref, g2_ref, be2_ref,
                  out_ref, *, batch, cin, c1, c2):
    """x_ref   : [B*Cin, V]  f32, rows = (batch, channel) fibers along V
       lapT_ref: [V, V]      MXU dtype (bf16 or f32), transposed Laplacian
       w*_ref  : [Fout, K*Fin] f32 shared Chebyshev weight, cols ordered (k,fin)
       g*/be*  : [Fout, 1]   f32 BatchNorm gamma / beta
       out_ref : [B*C2, V]   f32 output slab, rows = (batch, channel)
    """
    lapT = lapT_ref[...]
    mxu_dt = lapT.dtype

    def layer(x2d, w_kf, gamma_col, beta_col, fin, fout):
        V = x2d.shape[1]
        K = w_kf.shape[1] // fin

        # --- Chebyshev basis: whole batch in one matmul chain. --------------
        # MXU operands in mxu_dt; carries and the 2*X@L^T - X0 combine in f32.
        xs = [x2d]
        if K > 1:
            x1 = jnp.dot(x2d.astype(mxu_dt), lapT,
                         preferred_element_type=jnp.float32)
            xs.append(x1)
            x0 = x2d
            for _ in range(2, K):
                x2 = 2.0 * jnp.dot(x1.astype(mxu_dt), lapT,
                                   preferred_element_type=jnp.float32) - x0
                xs.append(x2)
                x0, x1 = x1, x2

        # --- Shared-weight contraction (no batch-block-diagonal zeros). -----
        # One K*Fin-deep matmul per batch element; w_mxu is identical for every
        # batch so it stays resident on the MXU across the loop.
        # (ChebConv bias omitted: cancelled by the BatchNorm mean subtraction.)
        w_mxu = w_kf.astype(mxu_dt)                       # [Fout, K*Fin]
        y_parts = []
        for b in range(batch):
            s_b = jnp.concatenate(
                [xk[b * fin:(b + 1) * fin, :] for xk in xs],
                axis=0).astype(mxu_dt)                    # [K*Fin, V], rows (k,fin)
            y_parts.append(jnp.dot(w_mxu, s_b,
                                   preferred_element_type=jnp.float32))
        y = jnp.concatenate(y_parts, axis=0)              # [B*Fout, V]

        # --- BatchNorm (training batch stats) + ReLU, all f32 on VPU/XLU. ---
        inv_n = 1.0 / (batch * V)
        row_sum = jnp.sum(y, axis=1, keepdims=True)       # [B*Fout, 1] lane reduce
        row_sq = jnp.sum(y * y, axis=1, keepdims=True)    # [B*Fout, 1]
        ch_sum = row_sum[0:fout, :]
        ch_sq = row_sq[0:fout, :]
        for b in range(1, batch):                         # fold batch blocks
            ch_sum = ch_sum + row_sum[b * fout:(b + 1) * fout, :]
            ch_sq = ch_sq + row_sq[b * fout:(b + 1) * fout, :]
        mean = ch_sum * inv_n                              # [Fout, 1]
        var = jnp.maximum(ch_sq * inv_n - mean * mean, 0.0)  # clamp >= 0
        scale = gamma_col * lax.rsqrt(var + _BN_EPS)       # [Fout, 1]
        shift = beta_col - mean * scale                    # [Fout, 1]
        # Pure layout broadcast back to (batch, channel) rows — no matmul.
        scale_rows = jnp.concatenate([scale] * batch, axis=0)  # [B*Fout, 1]
        shift_rows = jnp.concatenate([shift] * batch, axis=0)
        return jnp.maximum(y * scale_rows + shift_rows, 0.0)   # [B*Fout, V]

    y1 = layer(x_ref[...], w1_ref[...], g1_ref[...], be1_ref[...], cin, c1)
    y2 = layer(y1, w2_ref[...], g2_ref[...], be2_ref[...], c1, c2)
    out_ref[...] = y2


# ----------------------------------------------------------------------------
# Wrapper-side weight preparation (pure XLA, tiny tensors)
# ----------------------------------------------------------------------------
def _shared_cheb_weight(w):
    """Shared [Fout, K*Fin] weight reproducing deepsphere's cheb_conv pairing.

    Inputs are flattened with column index (fin*K + k) while the [K, Fin, Fout]
    weight tensor is .view-ed with row index (k*Fin + fin); the effective
    weight for basis element (k, fin) is therefore w_flat[fin*K + k].
    Output columns are ordered (k, fin) to match the per-batch basis slab.
    """
    K, Fin, Fout = w.shape
    w_flat = w.reshape(K * Fin, Fout)            # torch .view order
    w_eff = w_flat.reshape(Fin, K, Fout)         # [fin, k, fout]
    return jnp.transpose(w_eff, (2, 1, 0)).reshape(Fout, K * Fin).astype(jnp.float32)


def block_forward(x, lap, w1, b1, g1, be1, w2, b2, g2, be2,
                  *, mxu_dtype=jnp.bfloat16):
    """x: [B, Cin, V] f32; returns [B, Fout2, V] matching the torch Block."""
    B, Cin, V = x.shape
    K1, _, F1 = w1.shape
    K2, _, F2 = w2.shape

    # ChebConv biases intentionally unused: a per-channel constant added before
    # a training-mode BatchNorm is cancelled exactly by the mean subtraction.
    del b1, b2

    w1_kf = _shared_cheb_weight(w1)              # [F1, K*Cin]
    w2_kf = _shared_cheb_weight(w2)              # [F2, K*F1]

    col = lambda v: v.reshape(-1, 1).astype(jnp.float32)
    x_bc = x.reshape(B * Cin, V).astype(jnp.float32)      # rows (batch, chan)
    lapT = lap.T.astype(mxu_dtype)                         # MXU operand dtype

    args = (x_bc, lapT,
            w1_kf, col(g1), col(be1),
            w2_kf, col(g2), col(be2))

    # Advisory cost estimate for XLA scheduling around the custom call.
    flops = 0
    for fin, fout, k in ((Cin, F1, K1), (F1, F2, K2)):
        flops += 2 * (k - 1) * B * fin * V * V            # recursion matmuls
        flops += 2 * B * fout * k * fin * V                # weight contraction
        flops += 8 * B * fout * V                          # BN + ReLU epilogue
    bytes_accessed = int(sum(int(a.size) * a.dtype.itemsize for a in args)
                         + B * F2 * V * 4)
    cost = pl.CostEstimate(flops=int(flops), transcendentals=int(F1 + F2),
                           bytes_accessed=bytes_accessed)

    in_specs = [pl.BlockSpec(memory_space=pltpu.MemorySpace.VMEM)
                for _ in range(len(args))]
    out2d = pl.pallas_call(
        functools.partial(_block_kernel, batch=B, cin=Cin, c1=F1, c2=F2),
        out_shape=jax.ShapeDtypeStruct((B * F2, V), jnp.float32),
        in_specs=in_specs,
        out_specs=pl.BlockSpec(memory_space=pltpu.MemorySpace.VMEM),
        compiler_params=pltpu.CompilerParams(
            vmem_limit_bytes=48 * 1024 * 1024),   # explicit (headroom on v7x's 64 MiB)
        cost_estimate=cost,
    )(*args)

    return out2d.reshape(B, F2, V)               # rows (b, f) -> [B, Fout2, V]


# ----------------------------------------------------------------------------
# Pure-JAX reference (mirrors the torch code exactly, including the .view
# pairing and the ChebConv bias — which the kernel drops as a BN no-op)
# ----------------------------------------------------------------------------
def _ref_chebconv(lap, x, weight, bias):
    B, Fin, V = x.shape
    K, _, Fout = weight.shape
    x0 = jnp.transpose(x, (2, 1, 0)).reshape(V, Fin * B)
    stack = [x0]
    if K > 1:
        x1 = lap @ x0
        stack.append(x1)
        for _ in range(2, K):
            x2 = 2.0 * (lap @ x1) - x0
            stack.append(x2)
            x0, x1 = x1, x2
    inp = jnp.stack(stack, 0).reshape(K, V, Fin, B)
    inp = jnp.transpose(inp, (3, 1, 2, 0)).reshape(B * V, Fin * K)
    out = (inp @ weight.reshape(K * Fin, Fout)).reshape(B, V, Fout)
    out = jnp.transpose(out, (0, 2, 1))
    return out + bias[None, :, None]


def _ref_bn_relu(y, gamma, beta):
    mean = jnp.mean(y, axis=(0, 2), keepdims=True)
    var = jnp.mean((y - mean) ** 2, axis=(0, 2), keepdims=True)
    yn = (y - mean) / jnp.sqrt(var + _BN_EPS)
    yn = yn * gamma[None, :, None] + beta[None, :, None]
    return jnp.maximum(yn, 0.0)


def _ref_block(x, lap, w1, b1, g1, be1, w2, b2, g2, be2):
    y = _ref_bn_relu(_ref_chebconv(lap, x, w1, b1), g1, be1)
    y = _ref_bn_relu(_ref_chebconv(lap, y, w2, b2), g2, be2)
    return y


# ----------------------------------------------------------------------------
# Main
# ----------------------------------------------------------------------------
if __name__ == "__main__":
    B, V = 2, 128                      # V multiple of 128 -> lane-dense stores
    in_ch, int_ch, out_ch, K = 4, 8, 6, 3

    key = jax.random.PRNGKey(0)
    k_x, k_w1, k_w2 = jax.random.split(key, 3)

    # Deterministic input and Laplacian (rescaled ring-graph Laplacian).
    x = jax.random.normal(k_x, (B, in_ch, V), dtype=jnp.float32)
    ring = (2.0 * jnp.eye(V)
            - jnp.eye(V, k=1) - jnp.eye(V, k=-1)
            - jnp.eye(V, k=V - 1) - jnp.eye(V, k=-(V - 1)))
    lap = (2.0 * ring / 4.0 - jnp.eye(V)).astype(jnp.float32)  # spectrum ~[-1, 1]

    # ChebConv parameters: kaiming_initialization from the module.
    std1 = math.sqrt(2.0 / (in_ch * K))
    std2 = math.sqrt(2.0 / (int_ch * K))
    w1 = jax.random.normal(k_w1, (K, in_ch, int_ch), jnp.float32) * std1
    w2 = jax.random.normal(k_w2, (K, int_ch, out_ch), jnp.float32) * std2
    b1 = jnp.full((int_ch,), 0.01, jnp.float32)
    b2 = jnp.full((out_ch,), 0.01, jnp.float32)

    # BatchNorm1d default parameters (weight=1, bias=0).
    g1, be1 = jnp.ones((int_ch,), jnp.float32), jnp.zeros((int_ch,), jnp.float32)
    g2, be2 = jnp.ones((out_ch,), jnp.float32), jnp.zeros((out_ch,), jnp.float32)

    ref = _ref_block(x, lap, w1, b1, g1, be1, w2, b2, g2, be2)

    # 1) f32-operand run: validates the restructured dataflow exactly.
    out_f32 = block_forward(x, lap, w1, b1, g1, be1, w2, b2, g2, be2,
                            mxu_dtype=jnp.float32)
    out_f32 = jax.block_until_ready(out_f32)
    np.testing.assert_allclose(np.asarray(out_f32), np.asarray(ref),
                               rtol=1e-3, atol=1e-3)

    # 2) bf16-MXU-operand run (the optimized path): looser tolerance because
    #    the matmul inputs are intentionally rounded to bf16 (f32 accumulation
    #    and f32 recursion carries are kept).
    out_bf16 = block_forward(x, lap, w1, b1, g1, be1, w2, b2, g2, be2,
                             mxu_dtype=jnp.bfloat16)
    out_bf16 = jax.block_until_ready(out_bf16)
    np.testing.assert_allclose(np.asarray(out_bf16), np.asarray(ref),
                               rtol=5e-2, atol=5e-2)

    assert out_bf16.shape == (B, out_ch, V)
    print("KERNEL_OK")
</pallas_src>

<mosaic_0001>
module attributes {stable_mosaic.version = 11 : i64} {
  func.func @_block_kernel(%arg0: memref<8x128xf32, #tpu.memory_space<vmem>>, %arg1: memref<128x128xf32, #tpu.memory_space<vmem>>, %arg2: memref<8x12xf32, #tpu.memory_space<vmem>>, %arg3: memref<8x1xf32, #tpu.memory_space<vmem>>, %arg4: memref<8x1xf32, #tpu.memory_space<vmem>>, %arg5: memref<6x24xf32, #tpu.memory_space<vmem>>, %arg6: memref<6x1xf32, #tpu.memory_space<vmem>>, %arg7: memref<6x1xf32, #tpu.memory_space<vmem>>, %arg8: memref<12x128xf32, #tpu.memory_space<vmem>>) attributes {dimension_semantics = [], scalar_prefetch = 0 : i64, scratch_operands = 0 : i64, tpu.core_type = #tpu.core_type<tc>} {
    %c0 = arith.constant 0 : index
    %c0_0 = arith.constant 0 : index
    %0 = vector.load %arg1[%c0, %c0_0] : memref<128x128xf32, #tpu.memory_space<vmem>>, vector<128x128xf32>
    %c0_1 = arith.constant 0 : index
    %c0_2 = arith.constant 0 : index
    %1 = vector.load %arg0[%c0_1, %c0_2] : memref<8x128xf32, #tpu.memory_space<vmem>>, vector<8x128xf32>
    %c0_3 = arith.constant 0 : index
    %c0_4 = arith.constant 0 : index
    %2 = vector.load %arg2[%c0_3, %c0_4] : memref<8x12xf32, #tpu.memory_space<vmem>>, vector<8x12xf32>
    %c0_5 = arith.constant 0 : index
    %c0_6 = arith.constant 0 : index
    %3 = vector.load %arg3[%c0_5, %c0_6] : memref<8x1xf32, #tpu.memory_space<vmem>>, vector<8x1xf32>
    %c0_7 = arith.constant 0 : index
    %c0_8 = arith.constant 0 : index
    %4 = vector.load %arg4[%c0_7, %c0_8] : memref<8x1xf32, #tpu.memory_space<vmem>>, vector<8x1xf32>
    %cst = arith.constant dense<0.000000e+00> : vector<8x128xf32>
    %5 = tpu.matmul %1, %0, %cst {dimension_numbers = #tpu.dot_dimension_numbers<[1], [0], [0], [1], [0, 0, 1, 1], [], []>} : vector<8x128xf32>, vector<128x128xf32>, vector<8x128xf32> -> vector<8x128xf32>
    %cst_9 = arith.constant dense<0.000000e+00> : vector<8x128xf32>
    %6 = tpu.matmul %5, %0, %cst_9 {dimension_numbers = #tpu.dot_dimension_numbers<[1], [0], [0], [1], [0, 0, 1, 1], [], []>} : vector<8x128xf32>, vector<128x128xf32>, vector<8x128xf32> -> vector<8x128xf32>
    %cst_10 = arith.constant 2.000000e+00 : f32
    %7 = vector.broadcast %cst_10 : f32 to vector<8x128xf32>
    %8 = arith.mulf %7, %6 : vector<8x128xf32>
    %9 = arith.subf %8, %1 : vector<8x128xf32>
    %10 = vector.extract_strided_slice %1 {offsets = [0, 0], sizes = [4, 128], strides = [1, 1]} : vector<8x128xf32> to vector<4x128xf32>
    %11 = vector.extract_strided_slice %5 {offsets = [0, 0], sizes = [4, 128], strides = [1, 1]} : vector<8x128xf32> to vector<4x128xf32>
    %12 = vector.extract_strided_slice %9 {offsets = [0, 0], sizes = [4, 128], strides = [1, 1]} : vector<8x128xf32> to vector<4x128xf32>
    %13 = tpu.concatenate %10, %11, %12 in 0 : vector<4x128xf32>, vector<4x128xf32>, vector<4x128xf32> -> vector<12x128xf32>
    %cst_11 = arith.constant dense<0.000000e+00> : vector<8x128xf32>
    %14 = tpu.matmul %2, %13, %cst_11 {dimension_numbers = #tpu.dot_dimension_numbers<[1], [0], [0], [1], [0, 0, 1, 1], [], []>} : vector<8x12xf32>, vector<12x128xf32>, vector<8x128xf32> -> vector<8x128xf32>
    %15 = vector.extract_strided_slice %1 {offsets = [4, 0], sizes = [4, 128], strides = [1, 1]} : vector<8x128xf32> to vector<4x128xf32>
    %16 = vector.extract_strided_slice %5 {offsets = [4, 0], sizes = [4, 128], strides = [1, 1]} : vector<8x128xf32> to vector<4x128xf32>
    %17 = vector.extract_strided_slice %9 {offsets = [4, 0], sizes = [4, 128], strides = [1, 1]} : vector<8x128xf32> to vector<4x128xf32>
    %18 = tpu.concatenate %15, %16, %17 in 0 : vector<4x128xf32>, vector<4x128xf32>, vector<4x128xf32> -> vector<12x128xf32>
    %cst_12 = arith.constant dense<0.000000e+00> : vector<8x128xf32>
    %19 = tpu.matmul %2, %18, %cst_12 {dimension_numbers = #tpu.dot_dimension_numbers<[1], [0], [0], [1], [0, 0, 1, 1], [], []>} : vector<8x12xf32>, vector<12x128xf32>, vector<8x128xf32> -> vector<8x128xf32>
    %20 = tpu.concatenate %14, %19 in 0 : vector<8x128xf32>, vector<8x128xf32> -> vector<16x128xf32>
    %cst_13 = arith.constant dense<0.000000e+00> : vector<16xf32>
    %21 = vector.multi_reduction <add>, %20, %cst_13 [1] : vector<16x128xf32> to vector<16xf32>
    %22 = vector.shape_cast %21 : vector<16xf32> to vector<16x1xf32>
    %23 = arith.mulf %20, %20 : vector<16x128xf32>
    %cst_14 = arith.constant dense<0.000000e+00> : vector<16xf32>
    %24 = vector.multi_reduction <add>, %23, %cst_14 [1] : vector<16x128xf32> to vector<16xf32>
    %25 = vector.shape_cast %24 : vector<16xf32> to vector<16x1xf32>
    %26 = vector.extract_strided_slice %22 {offsets = [0, 0], sizes = [8, 1], strides = [1, 1]} : vector<16x1xf32> to vector<8x1xf32>
    %27 = vector.extract_strided_slice %25 {offsets = [0, 0], sizes = [8, 1], strides = [1, 1]} : vector<16x1xf32> to vector<8x1xf32>
    %28 = vector.extract_strided_slice %22 {offsets = [8, 0], sizes = [8, 1], strides = [1, 1]} : vector<16x1xf32> to vector<8x1xf32>
    %29 = arith.addf %26, %28 : vector<8x1xf32>
    %30 = vector.extract_strided_slice %25 {offsets = [8, 0], sizes = [8, 1], strides = [1, 1]} : vector<16x1xf32> to vector<8x1xf32>
    %31 = arith.addf %27, %30 : vector<8x1xf32>
    %cst_15 = arith.constant 3.906250e-03 : f32
    %32 = vector.broadcast %cst_15 : f32 to vector<8x1xf32>
    %33 = arith.mulf %29, %32 : vector<8x1xf32>
    %cst_16 = arith.constant 3.906250e-03 : f32
    %34 = vector.broadcast %cst_16 : f32 to vector<8x1xf32>
    %35 = arith.mulf %31, %34 : vector<8x1xf32>
    %36 = arith.mulf %33, %33 : vector<8x1xf32>
    %37 = arith.subf %35, %36 : vector<8x1xf32>
    %cst_17 = arith.constant 0.000000e+00 : f32
    %38 = vector.broadcast %cst_17 : f32 to vector<8x1xf32>
    %39 = arith.maximumf %37, %38 : vector<8x1xf32>
    %cst_18 = arith.constant 9.99999974E-6 : f32
    %40 = vector.broadcast %cst_18 : f32 to vector<8x1xf32>
    %41 = arith.addf %39, %40 : vector<8x1xf32>
    %42 = math.rsqrt %41 : vector<8x1xf32>
    %43 = arith.mulf %3, %42 : vector<8x1xf32>
    %44 = arith.mulf %33, %43 : vector<8x1xf32>
    %45 = arith.subf %4, %44 : vector<8x1xf32>
    %46 = tpu.concatenate %43, %43 in 0 : vector<8x1xf32>, vector<8x1xf32> -> vector<16x1xf32>
    %47 = tpu.concatenate %45, %45 in 0 : vector<8x1xf32>, vector<8x1xf32> -> vector<16x1xf32>
    %48 = vector.broadcast %46 : vector<16x1xf32> to vector<16x128xf32>
    %49 = arith.mulf %20, %48 : vector<16x128xf32>
    %50 = vector.broadcast %47 : vector<16x1xf32> to vector<16x128xf32>
    %51 = arith.addf %49, %50 : vector<16x128xf32>
    %cst_19 = arith.constant 0.000000e+00 : f32
    %52 = vector.broadcast %cst_19 : f32 to vector<16x128xf32>
    %53 = arith.maximumf %51, %52 : vector<16x128xf32>
    %c0_20 = arith.constant 0 : index
    %c0_21 = arith.constant 0 : index
    %54 = vector.load %arg5[%c0_20, %c0_21] : memref<6x24xf32, #tpu.memory_space<vmem>>, vector<6x24xf32>
    %c0_22 = arith.constant 0 : index
    %c0_23 = arith.constant 0 : index
    %55 = vector.load %arg6[%c0_22, %c0_23] : memref<6x1xf32, #tpu.memory_space<vmem>>, vector<6x1xf32>
    %c0_24 = arith.constant 0 : index
    %c0_25 = arith.constant 0 : index
    %56 = vector.load %arg7[%c0_24, %c0_25] : memref<6x1xf32, #tpu.memory_space<vmem>>, vector<6x1xf32>
    %cst_26 = arith.constant dense<0.000000e+00> : vector<16x128xf32>
    %57 = tpu.matmul %53, %0, %cst_26 {dimension_numbers = #tpu.dot_dimension_numbers<[1], [0], [0], [1], [0, 0, 1, 1], [], []>} : vector<16x128xf32>, vector<128x128xf32>, vector<16x128xf32> -> vector<16x128xf32>
    %cst_27 = arith.constant dense<0.000000e+00> : vector<16x128xf32>
    %58 = tpu.matmul %57, %0, %cst_27 {dimension_numbers = #tpu.dot_dimension_numbers<[1], [0], [0], [1], [0, 0, 1, 1], [], []>} : vector<16x128xf32>, vector<128x128xf32>, vector<16x128xf32> -> vector<16x128xf32>
    %cst_28 = arith.constant 2.000000e+00 : f32
    %59 = vector.broadcast %cst_28 : f32 to vector<16x128xf32>
    %60 = arith.mulf %59, %58 : vector<16x128xf32>
    %61 = arith.subf %60, %53 : vector<16x128xf32>
    %62 = vector.extract_strided_slice %53 {offsets = [0, 0], sizes = [8, 128], strides = [1, 1]} : vector<16x128xf32> to vector<8x128xf32>
    %63 = vector.extract_strided_slice %57 {offsets = [0, 0], sizes = [8, 128], strides = [1, 1]} : vector<16x128xf32> to vector<8x128xf32>
    %64 = vector.extract_strided_slice %61 {offsets = [0, 0], sizes = [8, 128], strides = [1, 1]} : vector<16x128xf32> to vector<8x128xf32>
    %65 = tpu.concatenate %62, %63, %64 in 0 : vector<8x128xf32>, vector<8x128xf32>, vector<8x128xf32> -> vector<24x128xf32>
    %cst_29 = arith.constant dense<0.000000e+00> : vector<6x128xf32>
    %66 = tpu.matmul %54, %65, %cst_29 {dimension_numbers = #tpu.dot_dimension_numbers<[1], [0], [0], [1], [0, 0, 1, 1], [], []>} : vector<6x24xf32>, vector<24x128xf32>, vector<6x128xf32> -> vector<6x128xf32>
    %67 = vector.extract_strided_slice %53 {offsets = [8, 0], sizes = [8, 128], strides = [1, 1]} : vector<16x128xf32> to vector<8x128xf32>
    %68 = vector.extract_strided_slice %57 {offsets = [8, 0], sizes = [8, 128], strides = [1, 1]} : vector<16x128xf32> to vector<8x128xf32>
    %69 = vector.extract_strided_slice %61 {offsets = [8, 0], sizes = [8, 128], strides = [1, 1]} : vector<16x128xf32> to vector<8x128xf32>
    %70 = tpu.concatenate %67, %68, %69 in 0 : vector<8x128xf32>, vector<8x128xf32>, vector<8x128xf32> -> vector<24x128xf32>
    %cst_30 = arith.constant dense<0.000000e+00> : vector<6x128xf32>
    %71 = tpu.matmul %54, %70, %cst_30 {dimension_numbers = #tpu.dot_dimension_numbers<[1], [0], [0], [1], [0, 0, 1, 1], [], []>} : vector<6x24xf32>, vector<24x128xf32>, vector<6x128xf32> -> vector<6x128xf32>
    %72 = tpu.concatenate %66, %71 in 0 : vector<6x128xf32>, vector<6x128xf32> -> vector<12x128xf32>
    %cst_31 = arith.constant dense<0.000000e+00> : vector<12xf32>
    %73 = vector.multi_reduction <add>, %72, %cst_31 [1] : vector<12x128xf32> to vector<12xf32>
    %74 = vector.shape_cast %73 : vector<12xf32> to vector<12x1xf32>
    %75 = arith.mulf %72, %72 : vector<12x128xf32>
    %cst_32 = arith.constant dense<0.000000e+00> : vector<12xf32>
    %76 = vector.multi_reduction <add>, %75, %cst_32 [1] : vector<12x128xf32> to vector<12xf32>
    %77 = vector.shape_cast %76 : vector<12xf32> to vector<12x1xf32>
    %78 = vector.extract_strided_slice %74 {offsets = [0, 0], sizes = [6, 1], strides = [1, 1]} : vector<12x1xf32> to vector<6x1xf32>
    %79 = vector.extract_strided_slice %77 {offsets = [0, 0], sizes = [6, 1], strides = [1, 1]} : vector<12x1xf32> to vector<6x1xf32>
    %80 = vector.extract_strided_slice %74 {offsets = [6, 0], sizes = [6, 1], strides = [1, 1]} : vector<12x1xf32> to vector<6x1xf32>
    %81 = arith.addf %78, %80 : vector<6x1xf32>
    %82 = vector.extract_strided_slice %77 {offsets = [6, 0], sizes = [6, 1], strides = [1, 1]} : vector<12x1xf32> to vector<6x1xf32>
    %83 = arith.addf %79, %82 : vector<6x1xf32>
    %cst_33 = arith.constant 3.906250e-03 : f32
    %84 = vector.broadcast %cst_33 : f32 to vector<6x1xf32>
    %85 = arith.mulf %81, %84 : vector<6x1xf32>
    %cst_34 = arith.constant 3.906250e-03 : f32
    %86 = vector.broadcast %cst_34 : f32 to vector<6x1xf32>
    %87 = arith.mulf %83, %86 : vector<6x1xf32>
    %88 = arith.mulf %85, %85 : vector<6x1xf32>
    %89 = arith.subf %87, %88 : vector<6x1xf32>
    %cst_35 = arith.constant 0.000000e+00 : f32
    %90 = vector.broadcast %cst_35 : f32 to vector<6x1xf32>
    %91 = arith.maximumf %89, %90 : vector<6x1xf32>
    %cst_36 = arith.constant 9.99999974E-6 : f32
    %92 = vector.broadcast %cst_36 : f32 to vector<6x1xf32>
    %93 = arith.addf %91, %92 : vector<6x1xf32>
    %94 = math.rsqrt %93 : vector<6x1xf32>
    %95 = arith.mulf %55, %94 : vector<6x1xf32>
    %96 = arith.mulf %85, %95 : vector<6x1xf32>
    %97 = arith.subf %56, %96 : vector<6x1xf32>
    %98 = tpu.concatenate %95, %95 in 0 : vector<6x1xf32>, vector<6x1xf32> -> vector<12x1xf32>
    %99 = tpu.concatenate %97, %97 in 0 : vector<6x1xf32>, vector<6x1xf32> -> vector<12x1xf32>
    %100 = vector.broadcast %98 : vector<12x1xf32> to vector<12x128xf32>
    %101 = arith.mulf %72, %100 : vector<12x128xf32>
    %102 = vector.broadcast %99 : vector<12x1xf32> to vector<12x128xf32>
    %103 = arith.addf %101, %102 : vector<12x128xf32>
    %cst_37 = arith.constant 0.000000e+00 : f32
    %104 = vector.broadcast %cst_37 : f32 to vector<12x128xf32>
    %105 = arith.maximumf %103, %104 : vector<12x128xf32>
    %c0_38 = arith.constant 0 : index
    %c0_39 = arith.constant 0 : index
    %106 = vector.load %arg8[%c0_38, %c0_39] : memref<12x128xf32, #tpu.memory_space<vmem>>, vector<12x128xf32>
    tpu.vector_store %arg8[%c0_38, %c0_39], %105 {strides = array<i32>} : memref<12x128xf32, #tpu.memory_space<vmem>>, vector<12x128xf32>,
    return
  }
}

</mosaic_0001>

<bundles_post_ra>
// kernel: tpu_custom_call.1
= control target key start
LH: loop header
LB: loop body
LE: loop exit
PB: predicated region body
PF: predicated region fallthrough
CT: control target
= control target key end

     0   :  { %13 = vsyncpa [#allocation3], 0  ;;  %s637_s0 = inlined_call_operand.vmem [shape: f32[8,128], index: 0, kind: input, shape index: {}]   ;;  %s638_s1 = inlined_call_operand.hbm [shape: f32[128,128], index: 1, kind: input, shape index: {}]   ;;  %s639_s2 = inlined_call_operand.vmem [shape: f32[8,12], index: 2, kind: input, shape index: {}]   ;;  %s640_s3 = inlined_call_operand.vmem [shape: f32[8,1], index: 3, kind: input, shape index: {}]   ;;  %s641_s4 = inlined_call_operand.vmem [shape: f32[8,1], index: 4, kind: input, shape index: {}]   ;;  %s642_s5 = inlined_call_operand.vmem [shape: f32[6,24], index: 5, kind: input, shape index: {}]   ;;  %s643_s6 = inlined_call_operand.vmem [shape: f32[6,1], index: 6, kind: input, shape index: {}]   ;;  %s644_s7 = inlined_call_operand.vmem [shape: f32[6,1], index: 7, kind: input, shape index: {}]   ;;  %s645_s8 = inlined_call_operand.hbm [shape: f32[12,128], index: 8, kind: output, shape index: {}]  }
   0x1   :  { %14 = vsyncpa [#allocation4], 0  ;;  %s21_s29 = sshll.u32 %s638_s1, 4  ;;  %s485_s30 = smov [#allocation2]   ;;  %s22_s29 = int_to_ptr.hbm [resolvable:$true] %s21_s29 }
   0x2   :  { %s23_s9 = sshll.u32 %s485_s30, 4  ;;  %s486_s10 = smov 128   ;;  %s24_s9 = int_to_ptr.vmem [resolvable:$true] %s23_s9 }
   0x3   :  { %s487_s11 = smov 8  }
   0x4   :  { %29 = dma.hbm_to_vmem [thread:$0]  %s22_s29, 2048, %s24_s9, [#allocation3], %s486_s10, %s486_s10, %s487_s11  }
   0x5   :  { %481 = dma.done.wait [#allocation3], 2048  }
   0x6   :  { %482 = vsyncadd [#allocation3], 4294965248  ;;  %v541_v0 = vld [vmem:[#allocation2 + $0x78] sm:$0xff]  ;;  %v543_v1 = vld [vmem:[#allocation2 + $0x70] sm:$0xff]  ;;  %vm111_vm0 = vcmask 1043456   ;;  %vm113_vm1 = vcmask 97280  }
   0x7   :  { %66 = vmatpush.msra.mxu0 %v541_v0  ;;  %86 = vmatpush.msra.mxu1 %v541_v0  ;;  %v547_v2 = vld [vmem:[#allocation2 + $0x68] sm:$0xff]  ;;  %v551_v3 = vld [vmem:[#allocation2 + $0x60] sm:$0xff]  ;;  %v555_v4 = vld [vmem:[#allocation2 + $0x58] sm:$0xff]  ;;  %v488_v31 = vmov 0   ;;  %vm267_vm5 = vcmask 195584   ;;  %vm314_vm6 = vcmask 1045504  }
   0x8   :  { %v559_v5 = vld [vmem:[#allocation2 + $0x50] sm:$0xff]  ;;  %v563_v6 = vld [vmem:[#allocation2 + $0x48] sm:$0xff]  ;;  %v567_v7 = vld [vmem:[#allocation2 + $0x40] sm:$0xff]  ;;  %426 = vset.pattern.permute.xlu2 %v488_v31  ;;  %428 = vset.pattern.permute.xlu0 %v488_v31  ;;  %vm330_vm7 = vcmask 1041408   ;;  %s402_s22 = sshll.u32 %s645_s8, 4  ;;  %s403_s22 = int_to_ptr.hbm [resolvable:$true] %s402_s22 }
   0x9   :  { %67 = vmatpush.msra.mxu0 %v543_v1  ;;  %87 = vmatpush.msra.mxu1 %v543_v1  ;;  %v571_v8 = vld [vmem:[#allocation2 + $0x38] sm:$0xff]  ;;  %v575_v9 = vld [vmem:[#allocation2 + $0x30] sm:$0xff]  ;;  %v51_v10 = vld [vmem:[#allocation2 + $0x28] sm:$0xff] }
   0xa   :  { %v50_v11 = vld [vmem:[#allocation2 + $0x20] sm:$0xff]  ;;  %v49_v12 = vld [vmem:[#allocation2 + $0x18] sm:$0xff]  ;;  %v48_v13 = vld [vmem:[#allocation2 + $0x10] sm:$0xff]  ;;  %427 = vset.pattern.permute.xlu1 %v488_v31 }
   0xb   :  { %68 = vmatpush.msra.mxu0 %v547_v2  ;;  %88 = vmatpush.msra.mxu1 %v547_v2  ;;  %v47_v14 = vld [vmem:[#allocation2 + $0x8] sm:$0xff]  ;;  %v46_v15 = vld [vmem:[#allocation2] sm:$0xff] }
   0xc   :  { %v62_v16 = vld [vmem:[%s637_s0] sm:$0xff] }
   0xd   :  { %69 = vmatpush.msra.mxu0 %v551_v3  ;;  %89 = vmatpush.msra.mxu1 %v551_v3  ;;  %v141_v22 = vrot.slane %v62_v16, 4  ;;  %v63_v24 = vld [vmem:[%s639_s2] sm:$0xff] }
   0xe   :  { %v64_v49 = vld [vmem:[%s640_s3] sm:$0xff] }
   0xf   :  { %70 = vmatpush.msra.mxu0 %v555_v4  ;;  %90 = vmatpush.msra.mxu1 %v555_v4  ;;  %v65_v54 = vld [vmem:[%s641_s4] sm:$0xff] }
  0x11   :  { %71 = vmatpush.msra.mxu0 %v559_v5  ;;  %91 = vmatpush.msra.mxu1 %v559_v5 }
  0x13   :  { %72 = vmatpush.msra.mxu0 %v563_v6  ;;  %92 = vmatpush.msra.mxu1 %v563_v6 }
  0x15   :  { %73 = vmatpush.msra.mxu0 %v567_v7  ;;  %93 = vmatpush.msra.mxu1 %v567_v7 }
  0x17   :  { %74 = vmatpush.msra.mxu0 %v571_v8  ;;  %94 = vmatpush.msra.mxu1 %v571_v8 }
  0x19   :  { %75 = vmatpush.msra.mxu0 %v575_v9  ;;  %95 = vmatpush.msra.mxu1 %v575_v9 }
  0x1b   :  { %76 = vmatpush.msra.mxu0 %v51_v10  ;;  %96 = vmatpush.msra.mxu1 %v51_v10 }
  0x1d   :  { %77 = vmatpush.msra.mxu0 %v50_v11  ;;  %97 = vmatpush.msra.mxu1 %v50_v11 }
  0x1f   :  { %78 = vmatpush.msra.mxu0 %v49_v12  ;;  %98 = vmatpush.msra.mxu1 %v49_v12 }
  0x21   :  { %79 = vmatpush.msra.mxu0 %v48_v13  ;;  %99 = vmatpush.msra.mxu1 %v48_v13 }
  0x23   :  { %80 = vmatpush.msra.mxu0 %v47_v14  ;;  %100 = vmatpush.msra.mxu1 %v47_v14 }
  0x25   :  { %81 = vmatpush.msra.mxu0 %v46_v15  ;;  %101 = vmatpush.msra.mxu1 %v46_v15 }
  0x26   :  { %82 = vmatmul.f32.vlgmr.msra.gmra.mxu0 %v62_v16 }
  0xa3   :  { %v83_v17 = vpop.f32.mrf.mxu0 }
  0xa4   :  { %102 = vmatmul.f32.vlgmr.msra.gmra.mxu1 %v83_v17  ;;  %v109_v20 = vrot.slane %v83_v17, 4  ;;  %v144_v26 = vsel %vm111_vm0, %v141_v22, %v83_v17 }
  0xa6   :  { %v112_v25 = vsel %vm111_vm0, %v62_v16, %v109_v20 }
 0x121   :  { %v103_v18 = vpop.f32.mrf.mxu1 }
 0x122   :  { %v106_v19 = vmul.f32 2.0, %v103_v18 }
 0x124   :  { %v107_v21 = vsub.f32 %v106_v19, %v62_v16 }
 0x126   :  { %415 = vmatpush.msk.msra.mxu2 %vm111_vm0, %v107_v21  ;;  %v143_v23 = vrot.slane %v107_v21, 4 }
 0x128   :  { %135 = vmatpush.msra.mxu2 %v112_v25  ;;  %417 = vmatpush.msk.msra.mxu3 %vm111_vm0, %v143_v23 }
 0x129   :  { %416 = vmatmul.msk.f32.vlgmr.msra.gmra.mxu2 %vm113_vm1, %v63_v24 }
 0x12a   :  { %162 = vmatpush.msra.mxu3 %v144_v26  ;;  %217 = vmatpush.msrb.mxu2 %v541_v0 }
 0x12b   :  { %418 = vmatmul.msk.f32.vlgmr.msra.gmra.mxu3 %vm113_vm1, %v63_v24 }
 0x12c   :  { %218 = vmatpush.msrb.mxu2 %v543_v1  ;;  %240 = vmatpush.msrb.mxu3 %v541_v0 }
 0x12e   :  { %219 = vmatpush.msrb.mxu2 %v547_v2  ;;  %241 = vmatpush.msrb.mxu3 %v543_v1 }
 0x130   :  { %220 = vmatpush.msrb.mxu2 %v551_v3  ;;  %242 = vmatpush.msrb.mxu3 %v547_v2 }
 0x132   :  { %221 = vmatpush.msrb.mxu2 %v555_v4  ;;  %243 = vmatpush.msrb.mxu3 %v551_v3 }
 0x134   :  { %222 = vmatpush.msrb.mxu2 %v559_v5  ;;  %244 = vmatpush.msrb.mxu3 %v555_v4 }
 0x136   :  { %223 = vmatpush.msrb.mxu2 %v563_v6  ;;  %245 = vmatpush.msrb.mxu3 %v559_v5 }
 0x138   :  { %224 = vmatpush.msrb.mxu2 %v567_v7  ;;  %246 = vmatpush.msrb.mxu3 %v563_v6 }
 0x13a   :  { %225 = vmatpush.msrb.mxu2 %v571_v8  ;;  %247 = vmatpush.msrb.mxu3 %v567_v7  ;;  %v214_v7 = vld [vmem:[%s642_s5] sm:$0x3f] }
 0x13c   :  { %226 = vmatpush.msrb.mxu2 %v575_v9  ;;  %248 = vmatpush.msrb.mxu3 %v571_v8 }
 0x13e   :  { %227 = vmatpush.msrb.mxu2 %v51_v10  ;;  %249 = vmatpush.msrb.mxu3 %v575_v9 }
 0x140   :  { %228 = vmatpush.msrb.mxu2 %v50_v11  ;;  %250 = vmatpush.msrb.mxu3 %v51_v10 }
 0x142   :  { %229 = vmatpush.msrb.mxu2 %v49_v12  ;;  %251 = vmatpush.msrb.mxu3 %v50_v11 }
 0x144   :  { %230 = vmatpush.msrb.mxu2 %v48_v13  ;;  %252 = vmatpush.msrb.mxu3 %v49_v12 }
 0x146   :  { %231 = vmatpush.msrb.mxu2 %v47_v14  ;;  %253 = vmatpush.msrb.mxu3 %v48_v13 }
 0x148   :  { %232 = vmatpush.msrb.mxu2 %v46_v15  ;;  %254 = vmatpush.msrb.mxu3 %v47_v14 }
 0x14a   :  { %255 = vmatpush.msrb.mxu3 %v46_v15 }
 0x1ac   :  { %v137_v27 = vpop.f32.mrf.mxu2 }
 0x1ad   :  { %167 = vadd.xlane.f32.xlu0 %v137_v27  ;;  %v171_v28 = vmul.f32 %v137_v27, %v137_v27 }
 0x1ae   :  { %v164_v29 = vpop.f32.mrf.mxu3 }
 0x1af   :  { %173 = vadd.xlane.f32.xlu1 %v171_v28  ;;  %v172_v30 = vmul.f32 %v164_v29, %v164_v29 }
 0x1b5   :  { %169 = vadd.xlane.f32.xlu0 %v164_v29 }
 0x1b7   :  { %175 = vadd.xlane.f32.xlu1 %v172_v30 }
 0x220   :  { %v168_v32 = vpop.xlane.xlu0 %167 }
 0x222   :  { %v174_v33 = vpop.xlane.xlu1 %173 }
 0x228   :  { %v170_v34 = vpop.xlane.xlu0 %169 }
 0x229   :  { %v177_v35 = vadd.f32 %v170_v34, %v168_v32 }
 0x22a   :  { %v176_v36 = vpop.xlane.xlu1 %175 }
 0x22b   :  { %v179_v37 = vmul.f32 0.00390625, %v177_v35  ;;  %v178_v38 = vadd.f32 %v176_v36, %v174_v33 }
 0x22d   :  { %v181_v39 = vmul.f32 %v179_v37, %v179_v37  ;;  %v180_v40 = vmul.f32 0.00390625, %v178_v38 }
 0x22f   :  { %v182_v41 = vsub.f32 %v180_v40, %v181_v39  ;;  %v215_v40 = vld [vmem:[%s643_s6] sm:$0x3f]  ;;  %s489_s6 = smov [#allocation5]  }
 0x231   :  { %v183_v42 = vmax.f32 %v182_v41, 0.0 }
 0x233   :  { %v184_v43 = vadd.f32 1e-05, %v183_v42 }
 0x235   :  { %429 = vrsqrt.f32 %v184_v43  ;;  %vm191_vm3 = vweird.f32 %v184_v43 }
 0x23b   :  { %v430_v44 = vpop.eup %429 }
 0x23c   :  { %v186_v45 = vmul.f32 %v430_v44, %v184_v43  ;;  %vm192_vm2 = vweird.f32 %v430_v44 }
 0x23d   :  { %vm193_vm4 = vmor %vm191_vm3, %vm192_vm2 }
 0x23e   :  { %v187_v46 = vmul.f32 %v430_v44, %v186_v45 }
 0x240   :  { %v188_v47 = vmul.f32 0.5, %v187_v46 }
 0x242   :  { %v189_v48 = vsub.f32 1.5, %v188_v47 }
 0x244   :  { %v190_v50 = vmul.f32 %v430_v44, %v189_v48 }
 0x246   :  { %v194_v51 = vsel %vm193_vm4, %v430_v44, %v190_v50  ;;  %v216_v44 = vld [vmem:[%s644_s7] sm:$0x3f]  ;;  %s400_s7 = sshll.u32 %s489_s6, 4  ;;  %s401_s7 = int_to_ptr.vmem [resolvable:$true] %s400_s7 }
 0x247   :  { %v195_v52 = vmul.f32 %v194_v51, %v64_v49 }
 0x249   :  { %200 = vperm.xlu2 %426, %v195_v52   ;;  %v196_v53 = vmul.f32 %v195_v52, %v179_v37 }
 0x24b   :  { %v197_v55 = vsub.f32 %v65_v54, %v196_v53 }
 0x251   :  { %207 = vperm.xlu2 %426, %v197_v55  }
 0x2a3   :  { %v201_v56 = vpop.permute.xlu2 %200 }
 0x2a4   :  { %v203_v57 = vmul.f32 %v201_v56, %v137_v27  ;;  %v204_v61 = vmul.f32 %v201_v56, %v164_v29 }
 0x2ab   :  { %v208_v58 = vpop.permute.xlu2 %207 }
 0x2ac   :  { %v210_v59 = vadd.f32 %v208_v58, %v203_v57  ;;  %v211_v62 = vadd.f32 %v208_v58, %v204_v61 }
 0x2ae   :  { %v212_v60 = vmax.f32 %v210_v59, 0.0  ;;  %v213_v63 = vmax.f32 %v211_v62, 0.0 }
 0x2b0   :  { %233 = vmatmul.f32.vlgmr.msrb.gmra.mxu2 %v212_v60 }
 0x2b8   :  { %236 = vmatmul.f32.gmra.mxu2 %v213_v63 }
 0x333   :  { %v234_v0 = vpop.f32.mrf.mxu2 }
 0x334   :  { %256 = vmatmul.f32.vlgmr.msrb.gmra.mxu3 %v234_v0 }
 0x33b   :  { %v237_v1 = vpop.f32.mrf.mxu2 }
 0x33c   :  { %259 = vmatmul.f32.gmra.mxu3 %v237_v1 }
 0x3b7   :  { %v257_v2 = vpop.f32.mrf.mxu3 }
 0x3b8   :  { %v263_v3 = vmul.f32 2.0, %v257_v2 }
 0x3ba   :  { %v265_v4 = vsub.f32 %v263_v3, %v212_v60 }
 0x3bc   :  { %284 = vmatpush.msrb.mxu0 %v265_v4 }
 0x3be   :  { %285 = vmatpush.msrb.mxu0 %v234_v0 }
 0x3bf   :  { %v260_v5 = vpop.f32.mrf.mxu3 }
 0x3c0   :  { %v264_v6 = vmul.f32 2.0, %v260_v5  ;;  %286 = vmatpush.msrb.mxu0 %v212_v60 }
 0x3c1   :  { %419 = vmatmul.msk.f32.vlgmr.msrb.gmra.mxu0 %vm267_vm5, %v214_v7 }
 0x3c2   :  { %v266_v8 = vsub.f32 %v264_v6, %v213_v63 }
 0x3c4   :  { %304 = vmatpush.msrb.mxu1 %v266_v8 }
 0x3c6   :  { %305 = vmatpush.msrb.mxu1 %v237_v1 }
 0x3c8   :  { %306 = vmatpush.msrb.mxu1 %v213_v63 }
 0x3c9   :  { %420 = vmatmul.msk.f32.vlgmr.msrb.gmra.mxu1 %vm267_vm5, %v214_v7 }
 0x43e   :  { %v288_v10 = vpop.f32.mrf.mxu0 }
 0x446   :  { %v308_v9 = vpop.f32.mrf.mxu1 }
 0x447   :  { %v312_v11 = vrot.slane %v308_v9, 2 }
 0x449   :  { %v318_v12 = vsel %vm111_vm0, %v312_v11, 0.0  ;;  %v315_v13 = vsel %vm314_vm6, %v288_v10, %v312_v11  ;;  %v322_v15 = vmul.f32 %v312_v11, %v312_v11 }
 0x44a   :  { %319 = vadd.xlane.f32.xlu1 %v318_v12  ;;  %316 = vadd.xlane.f32.xlu0 %v315_v13  ;;  %v321_v14 = vmul.f32 %v315_v13, %v315_v13 }
 0x44b   :  { %v325_v16 = vsel %vm111_vm0, %v322_v15, 0.0 }
 0x44c   :  { %323 = vadd.xlane.f32.xlu2 %v321_v14 }
 0x452   :  { %326 = vadd.xlane.f32.xlu0 %v325_v16 }
 0x4bd   :  { %v320_v17 = vpop.xlane.xlu1 %319  ;;  %v317_v18 = vpop.xlane.xlu0 %316 }
 0x4be   :  { %v332_v19 = vrot.slane %v320_v17, 6  ;;  %v331_v20 = vrot.slane %v317_v18, 6 }
 0x4bf   :  { %v324_v23 = vpop.xlane.xlu2 %323 }
 0x4c0   :  { %v333_v21 = vsel %vm330_vm7, %v331_v20, %v332_v19  ;;  %v338_v25 = vrot.slane %v324_v23, 6 }
 0x4c1   :  { %v335_v22 = vadd.f32 %v333_v21, %v317_v18 }
 0x4c3   :  { %v343_v27 = vmul.f32 0.00390625, %v335_v22 }
 0x4c5   :  { %v327_v24 = vpop.xlane.xlu0 %326  ;;  %v345_v30 = vmul.f32 %v343_v27, %v343_v27 }
 0x4c6   :  { %v339_v26 = vrot.slane %v327_v24, 6 }
 0x4c8   :  { %v340_v28 = vsel %vm330_vm7, %v338_v25, %v339_v26 }
 0x4c9   :  { %v342_v29 = vadd.f32 %v340_v28, %v324_v23 }
 0x4cb   :  { %v344_v31 = vmul.f32 0.00390625, %v342_v29 }
 0x4cd   :  { %v346_v32 = vsub.f32 %v344_v31, %v345_v30 }
 0x4cf   :  { %v347_v33 = vmax.f32 %v346_v32, 0.0 }
 0x4d1   :  { %v348_v34 = vadd.f32 1e-05, %v347_v33 }
 0x4d3   :  { %431 = vrsqrt.f32 %v348_v34  ;;  %vm355_vm9 = vweird.f32 %v348_v34 }
 0x4d9   :  { %v432_v35 = vpop.eup %431 }
 0x4da   :  { %v350_v36 = vmul.f32 %v432_v35, %v348_v34  ;;  %vm356_vm8 = vweird.f32 %v432_v35 }
 0x4db   :  { %vm357_vm10 = vmor %vm355_vm9, %vm356_vm8 }
 0x4dc   :  { %v351_v37 = vmul.f32 %v432_v35, %v350_v36 }
 0x4de   :  { %v352_v38 = vmul.f32 0.5, %v351_v37 }
 0x4e0   :  { %v353_v39 = vsub.f32 1.5, %v352_v38 }
 0x4e2   :  { %v354_v41 = vmul.f32 %v432_v35, %v353_v39 }
 0x4e4   :  { %v358_v42 = vsel %vm357_vm10, %v432_v35, %v354_v41 }
 0x4e5   :  { %v359_v43 = vmul.f32 %v358_v42, %v215_v40 }
 0x4e7   :  { %v363_v45 = vrot.slane %v359_v43, 2  ;;  %v360_v46 = vmul.f32 %v359_v43, %v343_v27 }
 0x4e9   :  { %376 = vperm.xlu0 %428, %v363_v45   ;;  %v365_v47 = vsel %vm314_vm6, %v359_v43, %v363_v45  ;;  %v361_v48 = vsub.f32 %v216_v44, %v360_v46 }
 0x4ea   :  { %372 = vperm.xlu1 %427, %v365_v47  }
 0x4eb   :  { %v367_v49 = vrot.slane %v361_v48, 2 }
 0x4ed   :  { %v369_v50 = vsel %vm314_vm6, %v361_v48, %v367_v49 }
 0x4f2   :  { %383 = vperm.xlu1 %427, %v369_v50  }
 0x4fa   :  { %387 = vperm.xlu1 %427, %v367_v49  }
 0x55b   :  { %v377_v56 = vpop.permute.xlu0 %376 }
 0x55c   :  { %v373_v51 = vpop.permute.xlu1 %372  ;;  %v380_v57 = vmul.f32 %v377_v56, %v312_v11 }
 0x55d   :  { %v379_v52 = vmul.f32 %v373_v51, %v315_v13 }
 0x564   :  { %v384_v53 = vpop.permute.xlu1 %383 }
 0x565   :  { %v390_v54 = vadd.f32 %v384_v53, %v379_v52 }
 0x567   :  { %v392_v55 = vmax.f32 %v390_v54, 0.0 }
 0x569   :  { %394 = vst [vmem:[#allocation5] sm:$0xff] %v392_v55 }
 0x56c   :  { %v388_v58 = vpop.permute.xlu1 %387 }
 0x56d   :  { %v391_v59 = vadd.f32 %v388_v58, %v380_v57 }
 0x56f   :  { %v393_v60 = vmax.f32 %v391_v59, 0.0 }
 0x571   :  { %395 = vst [vmem:[#allocation5 + $0x8] sm:$0xf] %v393_v60 }
 0x572   :  { %408 = dma.vmem_to_hbm [thread:$0]  %s401_s7, 256, %s403_s22, [#allocation4], %s486_s10, %s486_s10, %s487_s11  }
 0x573   :  { %483 = dma.done.wait [#allocation4], 256  }
 0x574   :  { %484 = vsyncadd [#allocation4], 4294967040 }
 0x575   :  { %413 = vsyncpa [#allocation3], 1 }
 0x576   :  { %414 = vsyncpa [#allocation4], 1 }

</bundles_post_ra>
